<compile_context>
chip_gen: v7x
topology: tpu7x:2x2x1
jax: 0.10.0
libtpu: 0.0.40
codegen_flags: <defaults>
</compile_context>

<pallas_src>
import functools

import jax
import jax.numpy as jnp
from jax.experimental import pallas as pl
from jax.experimental.pallas import tpu as pltpu


def _linear_lr_kernel(x_ref, wv_ref, wu_ref, bu_ref, wres_ref, o_ref,
                      acc_ref, hacc_ref, *, wv_slice, tk):
    ni = pl.program_id(1)
    ki = pl.program_id(2)
    nk = pl.num_programs(2)

    @pl.when(ki == 0)
    def _init_acc():
        acc_ref[...] = jnp.zeros_like(acc_ref)

    @pl.when(jnp.logical_and(ni == 0, ki == 0))
    def _init_hacc():
        hacc_ref[...] = jnp.zeros_like(hacc_ref)

    x = x_ref[...]                                                  # (tm, tk)

    # Full-rank residual path, accumulated in f32 over the K tiles.
    acc_ref[...] += jnp.dot(x, wres_ref[...],
                            preferred_element_type=jnp.float32)    # (tm, tn)

    # Low-rank bottleneck h = x @ Wv: computed only on the first N tile of
    # each M tile; hacc persists in scratch across the (arbitrary) N axis and
    # is reused for every other N tile of the same M tile.
    @pl.when(ni == 0)
    def _accum_h():
        if wv_slice:   # Wv fully resident in VMEM; slice the current K tile.
            ks = pl.multiple_of(ki * tk, tk)
            wv_blk = wv_ref[pl.ds(ks, tk), :]
        else:
            wv_blk = wv_ref[...]
        hacc_ref[...] += jnp.dot(x, wv_blk,
                                 preferred_element_type=jnp.float32)  # (tm,R)

    @pl.when(ki == nk - 1)
    def _finalize():
        # NOTE: h is cast to the compute dtype (e.g. bf16) before the MXU;
        # this intentionally trades the f32 intermediate for MXU throughput.
        h = hacc_ref[...].astype(wu_ref.dtype)
        low = jnp.dot(h, wu_ref[...], preferred_element_type=jnp.float32)
        out = acc_ref[...] + low + bu_ref[...].astype(jnp.float32)
        o_ref[...] = out.astype(o_ref.dtype)


def _round_up(x, m):
    return ((x + m - 1) // m) * m


def _vmem_capacity_bytes():
    try:
        return int(pltpu.get_tpu_info().vmem_capacity_bytes)
    except Exception:
        return 64 * 2 ** 20          # conservative fallback (v7x-sized)


def _choose_tiles(M, N, K, R, in_isz, out_isz, tm, tn, tk):
    vmem_cap = _vmem_capacity_bytes()
    # v7x: 64 MiB / TensorCore, 2 TCs per chip.  v5e/v6e: 128 MiB, 1 TC.
    small_vmem = vmem_cap <= 80 * 2 ** 20
    budget = min(int(0.70 * vmem_cap), 96 * 2 ** 20)

    # sublane packing multiple for the compute dtype (f32=8, bf16=16, int8=32)
    sub = 8 if in_isz >= 4 else (16 if in_isz == 2 else 32)

    # K tiling: contraction tiles must cover K exactly -> pad K when needed.
    if tk is None:
        tk = K if K <= 1024 else 512
    K_pad = _round_up(K, tk)

    # Hold Wv fully resident in VMEM (single HBM fetch) whenever it is small.
    wv_resident = 2 * K_pad * R * in_isz <= 8 * 2 ** 20

    if tn is None:
        tn = N if N <= 1024 else 1024           # lane-dense when tiled
    if tm is None:
        if small_vmem and M >= 2 * sub:
            # Guarantee >=2 blocks on the 'parallel' M axis -> both v7x TCs.
            tm = min(_round_up(pl.cdiv(M, 2), sub), 512)
        else:
            # 1-TC chips: single M tile when possible so Wres streams from
            # HBM exactly once (bandwidth-bound regime, esp. v5e).
            tm = M if M <= 1024 else 512

    def footprint(tm_, tn_, tk_):
        wv_b = 2 * (K_pad if wv_resident else tk_) * R * in_isz
        return (2 * tm_ * tk_ * in_isz           # x          (double-buffered)
                + 2 * tk_ * tn_ * in_isz         # Wres
                + 2 * R * tn_ * in_isz           # Wu
                + 2 * tn_ * 4                    # bias (f32)
                + wv_b                           # Wv
                + 2 * tm_ * tn_ * out_isz        # output (out dtype)
                + 4 * (tm_ * tn_ + tm_ * R))     # f32 accumulators

    # Shrink tiles (keep tn lane-dense, tm sublane-aligned) until they fit.
    while footprint(tm, tn, tk) > budget:
        if tn > 128 and tn % 256 == 0:
            tn //= 2
        elif tm > sub and tm % (2 * sub) == 0:
            tm //= 2
        else:
            break

    fp = footprint(tm, tn, tk)
    hard_cap = min(int(0.85 * vmem_cap), 100 * 2 ** 20)
    vmem_limit = int(min(max(int(1.3 * fp) + (4 << 20), 32 * 2 ** 20),
                         hard_cap))
    return tm, tn, tk, K_pad, wv_resident, vmem_limit


@functools.partial(jax.jit,
                   static_argnames=("tm", "tn", "tk", "compute_dtype"))
def linear_lr(x, wv_t, wu_t, bu, wres_t, *, tm=None, tn=None, tk=None,
              compute_dtype=jnp.bfloat16):
    """x: (..., in_features) -> (..., out_features).

    out = (x @ Wv) @ Wu + bu + x @ Wres.  Matmuls run in `compute_dtype`
    (default bf16); accumulation is f32, output keeps x.dtype.
    Pass compute_dtype=jnp.float32 (or None) for full-precision inputs.
    """
    out_dtype = x.dtype
    K = x.shape[-1]
    lead = x.shape[:-1]
    M = 1
    for d in lead:
        M *= d
    R = wv_t.shape[1]
    N = wu_t.shape[1]

    cdt = x.dtype if compute_dtype is None else compute_dtype
    x2 = x.reshape(M, K).astype(cdt)
    wv2 = wv_t.astype(cdt)
    wu2 = wu_t.astype(cdt)
    wres2 = wres_t.astype(cdt)
    bu2 = bu.reshape(1, N).astype(jnp.float32)     # bias added in f32 (exact)

    in_isz = jnp.dtype(cdt).itemsize
    out_isz = jnp.dtype(out_dtype).itemsize
    tm, tn, tk, K_pad, wv_resident, vmem_limit = _choose_tiles(
        M, N, K, R, in_isz, out_isz, tm, tn, tk)

    if K_pad != K:     # zero-pad the contraction dim (exact for a contraction)
        x2 = jnp.pad(x2, ((0, 0), (0, K_pad - K)))
        wv2 = jnp.pad(wv2, ((0, K_pad - K), (0, 0)))
        wres2 = jnp.pad(wres2, ((0, K_pad - K), (0, 0)))

    num_m = pl.cdiv(M, tm)
    num_n = pl.cdiv(N, tn)
    num_k = K_pad // tk

    if wv_resident:
        # Constant block index -> Wv is DMA'd from HBM exactly once.
        wv_spec = pl.BlockSpec((K_pad, R), lambda mi, ni, ki: (0, 0))
    else:
        wv_spec = pl.BlockSpec((tk, R), lambda mi, ni, ki: (ki, 0))
    wv_slice = wv_resident and (num_k > 1)

    kernel = functools.partial(_linear_lr_kernel, wv_slice=wv_slice, tk=tk)

    out = pl.pallas_call(
        kernel,
        out_shape=jax.ShapeDtypeStruct((M, N), out_dtype),
        grid_spec=pltpu.PrefetchScalarGridSpec(
            num_scalar_prefetch=0,
            grid=(num_m, num_n, num_k),        # M outer, N middle, K inner
            in_specs=[
                pl.BlockSpec((tm, tk), lambda mi, ni, ki: (mi, ki)),   # x
                wv_spec,                                               # Wv^T
                pl.BlockSpec((R, tn), lambda mi, ni, ki: (0, ni)),     # Wu^T
                pl.BlockSpec((1, tn), lambda mi, ni, ki: (0, ni)),     # u bias
                pl.BlockSpec((tk, tn), lambda mi, ni, ki: (ki, ni)),   # Wres^T
            ],
            out_specs=pl.BlockSpec((tm, tn), lambda mi, ni, ki: (mi, ni)),
            scratch_shapes=[
                pltpu.VMEM((tm, tn), jnp.float32),   # output accumulator
                pltpu.VMEM((tm, R), jnp.float32),    # x @ Wv accumulator
            ],
        ),
        compiler_params=pltpu.CompilerParams(
            # hacc carries across the N axis -> N must be "arbitrary".
            dimension_semantics=("parallel", "arbitrary", "arbitrary"),
            vmem_limit_bytes=vmem_limit,
        ),
    )(x2, wv2, wu2, bu2, wres2)
    return out.reshape(*lead, N)


def init_linear_lr_params(key, in_features, out_features, rank_ratio=0.25,
                          dtype=jnp.float32):
    """Deterministic init mimicking nn.Linear's U(-1/sqrt(fan_in), 1/sqrt(fan_in))."""
    rank = int(min(in_features, out_features) * rank_ratio)
    k_u, k_ub, k_v, k_r = jax.random.split(key, 4)

    def uinit(k, shape, fan_in):
        bound = 1.0 / jnp.sqrt(fan_in)
        return jax.random.uniform(k, shape, dtype, -bound, bound)

    # PyTorch stores Linear weight as (out, in); we keep the transposed form.
    wv_t = uinit(k_v, (in_features, rank), in_features)            # v.weight.T
    wu_t = uinit(k_u, (rank, out_features), rank)                  # u.weight.T
    bu = uinit(k_ub, (1, out_features), rank)                      # u.bias
    wres_t = uinit(k_r, (in_features, out_features), in_features)  # res.weight.T
    return wv_t, wu_t, bu, wres_t


if __name__ == "__main__":
    key = jax.random.PRNGKey(0)
    k_x, k_p, k_x2, k_p2 = jax.random.split(key, 4)

    # --- small demo shapes (module-scale smoke test, f32 compute path) ---
    batch, seq, in_features, out_features = 2, 8, 32, 32
    x = jax.random.normal(k_x, (batch, seq, in_features), dtype=jnp.float32)
    wv_t, wu_t, bu, wres_t = init_linear_lr_params(
        k_p, in_features, out_features, 0.25)

    out = linear_lr(x, wv_t, wu_t, bu, wres_t, compute_dtype=jnp.float32)
    jax.block_until_ready(out)

    xf = x.reshape(-1, in_features)
    ref = ((xf @ wv_t) @ wu_t + bu + xf @ wres_t).reshape(
        batch, seq, out_features)
    assert out.shape == (batch, seq, out_features)
    assert jnp.allclose(out, ref, atol=2e-5, rtol=2e-5), \
        float(jnp.max(jnp.abs(out - ref)))

    # --- larger shapes exercising the (M, N, K) grid + hacc reuse across N,
    #     default bf16 compute with f32 accumulation ---
    b2, s2, k2, n2 = 4, 128, 2048, 2048   # M=512, K tiles=4, >=2 N tiles
    x_big = jax.random.normal(k_x2, (b2, s2, k2), dtype=jnp.float32)
    wv2, wu2, bu2_, wres2 = init_linear_lr_params(k_p2, k2, n2, 0.25)

    out_big = linear_lr(x_big, wv2, wu2, bu2_, wres2)   # bf16 compute default
    jax.block_until_ready(out_big)

    # Reference mimics the kernel's precision path (bf16 inputs, f32 accum,
    # bottleneck activation cast to bf16 before the second matmul).
    xbf = x_big.reshape(-1, k2).astype(jnp.bfloat16)
    wvb = wv2.astype(jnp.bfloat16)
    wub = wu2.astype(jnp.bfloat16)
    wrb = wres2.astype(jnp.bfloat16)
    h = jnp.dot(xbf, wvb, preferred_element_type=jnp.float32)
    ref_big = (jnp.dot(h.astype(jnp.bfloat16), wub,
                       preferred_element_type=jnp.float32)
               + bu2_.astype(jnp.float32)
               + jnp.dot(xbf, wrb, preferred_element_type=jnp.float32)
               ).reshape(b2, s2, n2)
    err = float(jnp.max(jnp.abs(out_big - ref_big)))
    assert err < 2e-2, err   # tolerates accumulation-order / bf16 round deltas

    print("KERNEL_OK")
</pallas_src>

<mosaic_0001>
module attributes {stable_mosaic.version = 11 : i64} {
  func.func @_linear_lr_kernel(%arg0: i32, %arg1: i32, %arg2: i32, %arg3: memref<8x32xf32, #tpu.memory_space<vmem>>, %arg4: memref<32x8xf32, #tpu.memory_space<vmem>>, %arg5: memref<8x32xf32, #tpu.memory_space<vmem>>, %arg6: memref<1x32xf32, #tpu.memory_space<vmem>>, %arg7: memref<32x32xf32, #tpu.memory_space<vmem>>, %arg8: memref<8x32xf32, #tpu.memory_space<vmem>>, %arg9: memref<8x32xf32, #tpu.memory_space<vmem>>, %arg10: memref<8x8xf32, #tpu.memory_space<vmem>>) attributes {dimension_semantics = [#tpu.dimension_semantics<parallel>, #tpu.dimension_semantics<arbitrary>, #tpu.dimension_semantics<arbitrary>], iteration_bounds = array<i64: 2, 1, 1>, scalar_prefetch = 0 : i64, scratch_operands = 2 : i64, tpu.core_type = #tpu.core_type<tc>, window_params = [{transform_indices = @transform_0, window_bounds = array<i64: 8, 32>}, {pipeline_mode = #tpu.pipeline_mode<synchronous>, transform_indices = @transform_1, window_bounds = array<i64: 32, 8>}, {transform_indices = @transform_2, window_bounds = array<i64: 8, 32>}, {transform_indices = @transform_3, window_bounds = array<i64: 1, 32>}, {transform_indices = @transform_4, window_bounds = array<i64: 32, 32>}, {transform_indices = @transform_5, window_bounds = array<i64: 8, 32>}]} {
    %c0_i32 = arith.constant 0 : i32
    %0 = arith.cmpi eq, %arg2, %c0_i32 : i32
    %1 = arith.extui %0 : i1 to i32
    %c0_i32_0 = arith.constant 0 : i32
    %2 = arith.cmpi ne, %1, %c0_i32_0 : i32
    scf.if %2 {
      %cst_15 = arith.constant 0.000000e+00 : f32
      %20 = vector.broadcast %cst_15 : f32 to vector<8x32xf32>
      %c0_16 = arith.constant 0 : index
      %c0_17 = arith.constant 0 : index
      %21 = vector.load %arg9[%c0_16, %c0_17] : memref<8x32xf32, #tpu.memory_space<vmem>>, vector<8x32xf32>
      tpu.vector_store %arg9[%c0_16, %c0_17], %20 {strides = array<i32>} : memref<8x32xf32, #tpu.memory_space<vmem>>, vector<8x32xf32>,
    } else {
    }
    %c0_i32_1 = arith.constant 0 : i32
    %3 = arith.cmpi eq, %arg1, %c0_i32_1 : i32
    %c0_i32_2 = arith.constant 0 : i32
    %4 = arith.cmpi eq, %arg2, %c0_i32_2 : i32
    %5 = arith.andi %3, %4 : i1
    %6 = arith.extui %5 : i1 to i32
    %c0_i32_3 = arith.constant 0 : i32
    %7 = arith.cmpi ne, %6, %c0_i32_3 : i32
    scf.if %7 {
      %cst_15 = arith.constant 0.000000e+00 : f32
      %20 = vector.broadcast %cst_15 : f32 to vector<8x8xf32>
      %c0_16 = arith.constant 0 : index
      %c0_17 = arith.constant 0 : index
      %21 = vector.load %arg10[%c0_16, %c0_17] : memref<8x8xf32, #tpu.memory_space<vmem>>, vector<8x8xf32>
      tpu.vector_store %arg10[%c0_16, %c0_17], %20 {strides = array<i32>} : memref<8x8xf32, #tpu.memory_space<vmem>>, vector<8x8xf32>,
    } else {
    }
    %c0 = arith.constant 0 : index
    %c0_4 = arith.constant 0 : index
    %8 = vector.load %arg3[%c0, %c0_4] : memref<8x32xf32, #tpu.memory_space<vmem>>, vector<8x32xf32>
    %c0_5 = arith.constant 0 : index
    %c0_6 = arith.constant 0 : index
    %9 = vector.load %arg9[%c0_5, %c0_6] : memref<8x32xf32, #tpu.memory_space<vmem>>, vector<8x32xf32>
    %c0_7 = arith.constant 0 : index
    %c0_8 = arith.constant 0 : index
    %10 = vector.load %arg7[%c0_7, %c0_8] : memref<32x32xf32, #tpu.memory_space<vmem>>, vector<32x32xf32>
    %cst = arith.constant dense<0.000000e+00> : vector<8x32xf32>
    %11 = tpu.matmul %8, %10, %cst {dimension_numbers = #tpu.dot_dimension_numbers<[1], [0], [0], [1], [0, 0, 1, 1], [], []>} : vector<8x32xf32>, vector<32x32xf32>, vector<8x32xf32> -> vector<8x32xf32>
    %12 = arith.addf %9, %11 : vector<8x32xf32>
    %c0_9 = arith.constant 0 : index
    %c0_10 = arith.constant 0 : index
    %13 = vector.load %arg9[%c0_9, %c0_10] : memref<8x32xf32, #tpu.memory_space<vmem>>, vector<8x32xf32>
    tpu.vector_store %arg9[%c0_9, %c0_10], %12 {strides = array<i32>} : memref<8x32xf32, #tpu.memory_space<vmem>>, vector<8x32xf32>,
    %c0_i32_11 = arith.constant 0 : i32
    %14 = arith.cmpi eq, %arg1, %c0_i32_11 : i32
    %15 = arith.extui %14 : i1 to i32
    %c0_i32_12 = arith.constant 0 : i32
    %16 = arith.cmpi ne, %15, %c0_i32_12 : i32
    scf.if %16 {
      %c0_15 = arith.constant 0 : index
      %c0_16 = arith.constant 0 : index
      %20 = vector.load %arg4[%c0_15, %c0_16] : memref<32x8xf32, #tpu.memory_space<vmem>>, vector<32x8xf32>
      %c0_17 = arith.constant 0 : index
      %c0_18 = arith.constant 0 : index
      %21 = vector.load %arg10[%c0_17, %c0_18] : memref<8x8xf32, #tpu.memory_space<vmem>>, vector<8x8xf32>
      %cst_19 = arith.constant dense<0.000000e+00> : vector<8x8xf32>
      %22 = tpu.matmul %8, %20, %cst_19 {dimension_numbers = #tpu.dot_dimension_numbers<[1], [0], [0], [1], [0, 0, 1, 1], [], []>} : vector<8x32xf32>, vector<32x8xf32>, vector<8x8xf32> -> vector<8x8xf32>
      %23 = arith.addf %21, %22 : vector<8x8xf32>
      %c0_20 = arith.constant 0 : index
      %c0_21 = arith.constant 0 : index
      %24 = vector.load %arg10[%c0_20, %c0_21] : memref<8x8xf32, #tpu.memory_space<vmem>>, vector<8x8xf32>
      tpu.vector_store %arg10[%c0_20, %c0_21], %23 {strides = array<i32>} : memref<8x8xf32, #tpu.memory_space<vmem>>, vector<8x8xf32>,
    } else {
    }
    %c0_i32_13 = arith.constant 0 : i32
    %17 = arith.cmpi eq, %arg2, %c0_i32_13 : i32
    %18 = arith.extui %17 : i1 to i32
    %c0_i32_14 = arith.constant 0 : i32
    %19 = arith.cmpi ne, %18, %c0_i32_14 : i32
    scf.if %19 {
      %c0_15 = arith.constant 0 : index
      %c0_16 = arith.constant 0 : index
      %20 = vector.load %arg10[%c0_15, %c0_16] : memref<8x8xf32, #tpu.memory_space<vmem>>, vector<8x8xf32>
      %c0_17 = arith.constant 0 : index
      %c0_18 = arith.constant 0 : index
      %21 = vector.load %arg5[%c0_17, %c0_18] : memref<8x32xf32, #tpu.memory_space<vmem>>, vector<8x32xf32>
      %cst_19 = arith.constant dense<0.000000e+00> : vector<8x32xf32>
      %22 = tpu.matmul %20, %21, %cst_19 {dimension_numbers = #tpu.dot_dimension_numbers<[1], [0], [0], [1], [0, 0, 1, 1], [], []>} : vector<8x8xf32>, vector<8x32xf32>, vector<8x32xf32> -> vector<8x32xf32>
      %c0_20 = arith.constant 0 : index
      %c0_21 = arith.constant 0 : index
      %23 = vector.load %arg9[%c0_20, %c0_21] : memref<8x32xf32, #tpu.memory_space<vmem>>, vector<8x32xf32>
      %24 = arith.addf %23, %22 : vector<8x32xf32>
      %c0_22 = arith.constant 0 : index
      %c0_23 = arith.constant 0 : index
      %25 = vector.load %arg6[%c0_22, %c0_23] : memref<1x32xf32, #tpu.memory_space<vmem>>, vector<1x32xf32>
      %26 = vector.broadcast %25 : vector<1x32xf32> to vector<8x32xf32>
      %27 = arith.addf %24, %26 : vector<8x32xf32>
      %c0_24 = arith.constant 0 : index
      %c0_25 = arith.constant 0 : index
      %28 = vector.load %arg8[%c0_24, %c0_25] : memref<8x32xf32, #tpu.memory_space<vmem>>, vector<8x32xf32>
      tpu.vector_store %arg8[%c0_24, %c0_25], %27 {strides = array<i32>} : memref<8x32xf32, #tpu.memory_space<vmem>>, vector<8x32xf32>,
    } else {
    }
    return
  }
  func.func @transform_0(%arg0: i32, %arg1: i32, %arg2: i32) -> (i32, i32) {
    %c0_i32 = arith.constant 0 : i32
    return %arg0, %arg2 : i32, i32
  }
  func.func @transform_1(%arg0: i32, %arg1: i32, %arg2: i32) -> (i32, i32) {
    %c0_i32 = arith.constant 0 : i32
    %c0_i32_0 = arith.constant 0 : i32
    %c0_i32_1 = arith.constant 0 : i32
    return %c0_i32, %c0_i32_0 : i32, i32
  }
  func.func @transform_2(%arg0: i32, %arg1: i32, %arg2: i32) -> (i32, i32) {
    %c0_i32 = arith.constant 0 : i32
    %c0_i32_0 = arith.constant 0 : i32
    return %c0_i32, %arg1 : i32, i32
  }
  func.func @transform_3(%arg0: i32, %arg1: i32, %arg2: i32) -> (i32, i32) {
    %c0_i32 = arith.constant 0 : i32
    %c0_i32_0 = arith.constant 0 : i32
    return %c0_i32, %arg1 : i32, i32
  }
  func.func @transform_4(%arg0: i32, %arg1: i32, %arg2: i32) -> (i32, i32) {
    %c0_i32 = arith.constant 0 : i32
    return %arg2, %arg1 : i32, i32
  }
  func.func @transform_5(%arg0: i32, %arg1: i32, %arg2: i32) -> (i32, i32) {
    %c0_i32 = arith.constant 0 : i32
    return %arg0, %arg1 : i32, i32
  }
}

</mosaic_0001>

<bundles_post_ra>
// kernel: linear_lr.1
= control target key start
LH: loop header
LB: loop body
LE: loop exit
PB: predicated region body
PF: predicated region fallthrough
CT: control target
= control target key end

     0   :  { %10 = vsyncpa [#allocation5], 0  ;;  %s1112_s0 = inlined_call_operand.vmem [shape: f32[16,32], index: 0, kind: input, shape index: {}]   ;;  %s1113_s1 = inlined_call_operand.vmem [shape: f32[32,8], index: 1, kind: input, shape index: {}]   ;;  %s1114_s2 = inlined_call_operand.vmem [shape: f32[8,32], index: 2, kind: input, shape index: {}]   ;;  %s1115_s3 = inlined_call_operand.vmem [shape: f32[1,32], index: 3, kind: input, shape index: {}]   ;;  %s1116_s4 = inlined_call_operand.vmem [shape: f32[32,32], index: 4, kind: input, shape index: {}]   ;;  %s1117_s5 = inlined_call_operand.hbm [shape: f32[16,32], index: 5, kind: output, shape index: {}]  }
   0x1   :  { %12 = vsyncpa [#allocation5 + $0x1], 0  ;;  %s957_s18 = smov 0   ;;  %s959_s19 = smov 0  }
   0x2   :  { %s961_s20 = smov 0   ;;  %s963_s21 = smov 0  }
   0x3   :  { %s965_s22 = smov 0   ;;  %s967_s23 = smov 0  }
   0x4 LB: > { %s716_s24 = sadd.s32 4294967295, %s921_s23   ;;  %s717_s25 = sadd.s32 4294967294, %s921_s23   ;;  %s921_s23 = sphi %s967_s23, %s18_s23   ;;  %s917_s22 = sphi %s965_s22, %s1124_s22   ;;  %s913_s21 = sphi %s963_s21, %s1123_s21   ;;  %s909_s20 = sphi %s961_s20, %s1122_s20   ;;  %s905_s19 = sphi %s959_s19, %s1121_s19   ;;  %s901_s18 = sphi %s957_s18, %s1120_s18  }
   0x5   : > { %s37_s26 = sadd.s32 1, %s917_s22  ;;  %s175_s27 = sadd.s32 1, %s909_s20 }
   0x6   : > { %p39_p0 = scmp.ge.s32.totalorder %s37_s26, 2  ;;  %p185_p1 = scmp.ne.s32.totalorder %s909_s20, %s905_s19 }
   0x7   : > { %p186_p2 = scmp.eq.s32.totalorder %s716_s24, 1  ;;  %p191_p3 = scmp.ne.s32.totalorder %s905_s19, %s901_s18 }
   0x8   : > { %s1126_s26 = smov (%p39_p0, %s37_s26), 0  ;;  %p192_p5 = scmp.eq.s32.totalorder %s717_s25, 1 }
   0x9   : > { %p997_p4 = por %p186_p2, %p185_p1  ;;  %s170_s29 = ssub.s32 %s917_s22, %s1126_s26 }
   0xa   : > { %p723_p6 = scmp.ge.s32.totalorder %s921_s23, 1  ;;  %p173_p7 = scmp.eq.s32.totalorder %s170_s29, 0 }
   0xb   : > { %p1004_p8 = por %p192_p5, %p191_p3  ;;  %p248_p9 = scmp.lt.s32.totalorder %s921_s23, 3 }
   0xc   : > { %s1010_s6 = scalar_select %p173_p7, %s909_s20, %s175_s27  }
   0xd   : > { %p249_p10 = pnand %p723_p6, %p248_p9 }
   0xe   : > { %v414_v0 = vld [vmem:[%s1113_s1] sm:$0xff] (!%p249_p10)  ;;  %v415_v1 = vld [vmem:[%s1113_s1 + $0x8] sm:$0xff] (!%p249_p10)  ;;  %v416_v2 = vld [vmem:[%s1113_s1 + $0x10] sm:$0xff] (!%p249_p10)  ;;  %v923_v3 = vmov (!%p249_p10), 0.0|0.0   ;;  %vm924_vm0 = vmmov (!%p249_p10), 0   ;;  %v925_v6 = vmov (!%p249_p10), 0.0  }
   0xf   : > { %252 = sbr.rel (%p249_p10) target bundleno = 479 (0x1df), region = 40  ;;  %779 = vmatprep.subr.bf16.mxu1 (!%p249_p10), %v923_v3  ;;  %v780_v4 = vpack.c.bf16 (!%p249_p10), %v415_v1, %v414_v0  ;;  %v417_v5 = vld [vmem:[%s1113_s1 + $0x18] sm:$0xff] (!%p249_p10)  ;;  %765 = vmatprep.mubr.msk.f32.mxu1 (!%p249_p10), %vm924_vm0, %v925_v6  ;;  %p293_p11 = scmp.lt.s32.totalorder (!%p249_p10), %s913_s21, 1  ;;  %vm320_vm1 = vcmask (!%p249_p10), 261120   ;;  %v331_v7 = vld [vmem:[%s1116_s4] sm:$0xff] (!%p249_p10)  ;;  %v332_v8 = vld [vmem:[%s1116_s4 + $0x8] sm:$0xff] (!%p249_p10) }
  0x10   : > { %vm327_vm2 = vcmask (!%p249_p10), 64512   ;;  %321 = vst.msk [vmem:[#allocation2] sm:$0xff] (!%p249_p10), %vm320_vm1, %v925_v6  ;;  %773 = vmatprep.subr.bf16.mxu0 (!%p249_p10), %v923_v3  ;;  %v774_v9 = vpack.c.bf16 (!%p249_p10), %v332_v8, %v331_v7  ;;  %v333_v10 = vld [vmem:[%s1116_s4 + $0x10] sm:$0xff] (!%p249_p10)  ;;  %v334_v11 = vld [vmem:[%s1116_s4 + $0x18] sm:$0xff] (!%p249_p10)  ;;  %754 = vmatprep.mubr.msk.f32.mxu0 (!%p249_p10), %vm924_vm0, %v925_v6  ;;  %v783_v12 = vpack.c.bf16 (!%p249_p10), %v417_v5, %v416_v2  ;;  %v496_v15 = vld [vmem:[%s1114_s2] sm:$0xff] (!%p249_p10)  ;;  %s290_s15 = sand.u32 (!%p249_p10), 1, %s905_s19  }
  0x11   : > { %328 = vst.msk [vmem:[#allocation3] sm:$0xff] (!%p249_p10), %vm327_vm2, %v925_v6  ;;  %781 = vmatpush3.bf16.msra.mxu1 (!%p249_p10), %v780_v4  ;;  %v777_v13 = vpack.c.bf16 (!%p249_p10), %v334_v11, %v333_v10  ;;  %s724_s16 = sshll.u32 (!%p249_p10), %s290_s15, 3  ;;  %v729_v27 = vld [vmem:[%s1115_s3] ss:$0 sm:$0xff] (!%p249_p10)  ;;  %s731_s25 = sshll.u32 (!%p249_p10), %s913_s21, 7 }
  0x12   : > { %782 = vmatprep.subr.bf16.mxu1 (!%p249_p10), %v923_v3  ;;  %775 = vmatpush3.bf16.msra.mxu0 (!%p249_p10), %v774_v9  ;;  %s292_s27 = scalar_lea.vmem (!%p249_p10), [#allocation4], %s724_s16  ;;  %s583_s10 = scalar_lea.sflag (!%p249_p10), [#allocation5], %s290_s15 }
  0x13   : > { %776 = vmatprep.subr.bf16.mxu0 (!%p249_p10), %v923_v3  ;;  %s597_s29 = sshll.u32 (!%p249_p10), %s292_s27, 4  ;;  %s1066_s29 = int_to_ptr.vmem [resolvable:$true] %s597_s29 }
  0x14   : > { %s843_s11 = scalar_lea.vmem (!%p249_p10), %s1066_s29, 128 }
  0x15   : > { %784 = vmatpush3.bf16.msra.mxu1 (!%p249_p10), %v783_v12  ;;  %p844_p12 = scmp.ne.s32.totalorder (!%p249_p10), %s1066_s29, %s843_s11 }
  0x16   : > { %s294_s8 = scalar_select %p293_p11, %s913_s21, 1  ;;  %778 = vmatpush3.bf16.msra.mxu0 %v777_v13 }
  0x17   : > { %768 = vmatprep.subr.mxu0 %v925_v6  ;;  %v330_v17 = vld [vmem:[#allocation2] sm:$0xff]  ;;  %p845_p13 = pnand %p844_p12, %p997_p4  ;;  %s926_s21 = smov [#allocation4]  }
  0x18   : > { %s725_s9 = sshll.u32 %s294_s8, 3  ;;  %v418_v16 = vld [vmem:[#allocation3] sm:$0xff] }
  0x19   : > { %s299_s12 = scalar_lea.vmem %s1112_s0, %s725_s9  ;;  %s1064_s9 = scalar_lea.hbm %s1117_s5, %s731_s25 }
  0x1a   : > { %v329_v14 = vld [vmem:[%s299_s12] sm:$0xff]  ;;  %p846_p0 = pneg %p845_p13  ;;  %s847_s12 = sshll.u32 %s926_s21, 4  ;;  %s848_s12 = int_to_ptr.vmem [resolvable:$false] %s847_s12 }
  0x1b   : > { %766 = vmatmul.mubr.msk.f32.vlgmr.msra.gmra.mrb[0].mxu1 %vm320_vm1, %v329_v14  ;;  %755 = vmatmul.mubr.msk.f32.vlgmr.msra.gmra.mrb[0].mxu0 %vm320_vm1, %v329_v14  ;;  %s849_s13 = scalar_lea.vmem %s848_s12, 256  ;;  %p850_p1 = scmp.lt.s32.totalorder %s1066_s29, %s848_s12 }
  0x1c   : > { %770 = vmatprep.mubr.msk.f32.mxu0 %vm924_vm0, %v925_v6  ;;  %769 = vmatpush3.msra.mxu0 %v496_v15  ;;  %p851_p2 = scmp.lt.s32.totalorder %s849_s13, %s843_s11 }
  0x1e   : > { %p852_p3 = por %p851_p2, %p850_p1 }
  0x20   : > { %p853_p5 = pnand %p852_p3, %p846_p0 }
  0xee   : > { %v485_v18 = vpop.f32.mrb[0].mxu1  ;;  %v405_v21 = vpop.f32.mrb[0].mxu0 }
  0xef   : > { %v489_v19 = vadd.f32 %v485_v18, %v418_v16  ;;  %v767_v20 = vpop.f32.mrb[1].mxu1  ;;  %v409_v22 = vadd.f32 %v405_v21, %v330_v17  ;;  %v756_v23 = vpop.f32.mrb[1].mxu0 }
  0xf1   : > { %491 = vst.msk [vmem:[#allocation3] sm:$0xff] %vm327_vm2, %v489_v19 }
  0xf2   : > { %410 = vst.msk [vmem:[#allocation2] sm:$0xff] %vm320_vm1, %v409_v22 }
  0xf8   : > { %v495_v24 = vld [vmem:[#allocation3] sm:$0xff] }
  0xf9   : > { %771 = vmatmul.mubr.msk.f32.vlgmr.msra.gmra.mrb[2].mxu0 %vm327_vm2, %v495_v24  ;;  %v571_v25 = vld [vmem:[#allocation2] sm:$0xff] }
 0x1cc   : > { %v567_v26 = vpop.f32.mrb[2].mxu0 }
 0x1cd   : > { %v572_v28 = vadd.f32 %v571_v25, %v567_v26  ;;  %v772_v29 = vpop.f32.mrb[3].mxu0 }
 0x1cf   : > { %v580_v30 = vadd.f32 %v729_v27, %v572_v28 }
 0x1d1   : > { %581 = vst.msk [vmem:[%s292_s27] sm:$0xff] %vm320_vm1, %v580_v30 }
 0x1d2   : > { %856 = shalt.err (!%p853_p5)
}
 0x1d3   : > { %s857_s14 = scalar_lea.hbm %s1064_s9, 128  ;;  %s861_s17 = scalar_lea.hbm %s1117_s5, 256 }
 0x1d4   : > { %p858_p6 = scmp.ne.s32.totalorder %s1064_s9, %s857_s14  ;;  %p862_p10 = scmp.lt.u32.totalorder %s1064_s9, %s1117_s5 }
 0x1d5   : > { %p863_p11 = scmp.lt.u32.totalorder %s861_s17, %s857_s14  ;;  %p865_p13 = scmp.lt.u32.totalorder %s857_s14, %s1064_s9 }
 0x1d6   : > { %p859_p7 = pnand %p858_p6, %p997_p4 }
 0x1d7   : > { %p864_p12 = por %p863_p11, %p862_p10 }
 0x1d8   : > { %p860_p9 = pneg %p859_p7 }
 0x1d9   : > { %p866_p0 = por %p865_p13, %p864_p12 }
 0x1db   : > { %p867_p1 = pnand %p866_p0, %p860_p9 }
 0x1dd   : > { %870 = shalt.err (!%p867_p1)
}
 0x1de   : > { %785 = dma.vmem_to_hbm [thread:$0]  (%p997_p4), %s1066_s29, 128, %s1064_s9, %s583_s10  }
 0x1df PF: > { %p791_p2 = scmp.ge.s32.totalorder %s921_s23, 2  ;;  %s609_s27 = sand.u32 1, %s901_s18  }
 0x1e0   : > { %s610_s7 = scalar_lea.sflag [#allocation5], %s609_s27 }
 0x1e1   : > { %p788_p3 = pnand %p791_p2, %p1004_p8 }
 0x1e3   : > { %896 = dma.done.wait (!%p788_p3), %s610_s7, 128  }
 0x1e4   : > { %898 = vsyncadd (!%p788_p3), %s610_s7, 4294967168  ;;  %s18_s23 = sadd.s32 1, %s921_s23   ;;  %s1120_s18 = smov %s905_s19 }
 0x1e5   : > { %p15_p5 = scmp.ge.s32.totalorder %s18_s23, 4   ;;  %s1121_s19 = smov %s909_s20 }
 0x1e6   : > { %s1122_s20 = smov %s1010_s6  ;;  %s1123_s21 = smov %s917_s22 }
 0x1e7   : > { %s1124_s22 = smov %s1126_s26  ;;  %17 = sbr.rel (!%p15_p5) target bundleno = 4 (0x4), region = 100 }
 0x1ee   :  { %615 = vsyncpa [#allocation5], 1 }
 0x1ef   :  { %617 = vsyncpa [#allocation5 + $0x1], 1 }

</bundles_post_ra>
